<compile_context>
chip_gen: v5e
topology: v5e:2x2
jax: 0.10.0
libtpu: 0.0.40
codegen_flags: <defaults>
</compile_context>

<pallas_src>
import functools
import numpy as np

import jax
import jax.numpy as jnp
from jax.experimental import pallas as pl
from jax.experimental.pallas import tpu as pltpu


# ----------------------------- helpers ---------------------------------------

def _layernorm(x, gamma, beta, eps=1e-6):
    # x: (L, D); gamma/beta: (1, D) -- f32 math
    mu = jnp.mean(x, axis=-1, keepdims=True)
    var = jnp.mean((x - mu) ** 2, axis=-1, keepdims=True)
    return (x - mu) * jax.lax.rsqrt(var + eps) * gamma + beta


def _sinusoid_table(n_position, d_hid):
    pos = np.arange(n_position)[:, None].astype(np.float64)
    hid = np.arange(d_hid)[None, :]
    angle = pos / np.power(10000.0, 2.0 * (hid // 2) / d_hid)
    table = np.zeros((n_position, d_hid), dtype=np.float64)
    table[:, 0::2] = np.sin(angle[:, 0::2])
    table[:, 1::2] = np.cos(angle[:, 1::2])
    return jnp.asarray(table, dtype=jnp.float32)


# ----------------------------- Pallas kernels --------------------------------

def _prelude_kernel(x_ref, pos_ref, g_ref, b_ref, out_ref):
    # Fallback only (n_layers == 0): pos-enc add + first LayerNorm.
    out_ref[0] = _layernorm(x_ref[0] + pos_ref[...], g_ref[...], b_ref[...])


def _decoder_layer_kernel(*refs, n_head, d_k, d_v, fuse_prelude):
    if fuse_prelude:
        (x_ref, bias_ref, pos_ref, g0_ref, b0_ref,
         wq_ref, wk_ref, wv_ref, wfc_ref, ln1_g_ref, ln1_b_ref,
         w1_ref, b1_ref, w2_ref, b2_ref, ln2_g_ref, ln2_b_ref, out_ref) = refs
    else:
        (x_ref, bias_ref,
         wq_ref, wk_ref, wv_ref, wfc_ref, ln1_g_ref, ln1_b_ref,
         w1_ref, b1_ref, w2_ref, b2_ref, ln2_g_ref, ln2_b_ref, out_ref) = refs

    x = x_ref[0]                                  # (L, D) f32
    if fuse_prelude:
        # fused prelude: positional-encoding add + Decoder's first LayerNorm
        x = _layernorm(x + pos_ref[...], g0_ref[...], b0_ref[...])

    bias = bias_ref[0]                            # (L, L) additive mask: 0 or -1e9
    L, D = x.shape
    xb = x.astype(jnp.bfloat16)

    # --- multi-head self attention (bf16 matmuls, f32 accumulation) -----------
    q = jnp.dot(xb, wq_ref[...], preferred_element_type=jnp.float32)   # (L, H*dk)
    k = jnp.dot(xb, wk_ref[...], preferred_element_type=jnp.float32)   # (L, H*dk)
    v = jnp.dot(xb, wv_ref[...], preferred_element_type=jnp.float32)   # (L, H*dv)
    q = q * (1.0 / (d_k ** 0.5))                  # scale Q once (not per-head scores)

    attn = jnp.zeros((L, D), jnp.float32)
    for h in range(n_head):
        q_h = q[:, h * d_k:(h + 1) * d_k].astype(jnp.bfloat16)         # (L, dk)
        k_h = k[:, h * d_k:(h + 1) * d_k].astype(jnp.bfloat16)         # (L, dk)
        v_h = v[:, h * d_v:(h + 1) * d_v].astype(jnp.bfloat16)         # (L, dv)

        # q @ k^T via dot_general contracting dim 1 of both (no explicit transpose)
        s = jax.lax.dot_general(q_h, k_h, (((1,), (1,)), ((), ())),
                                preferred_element_type=jnp.float32)    # (L, L)
        s = s + bias
        s = s - jnp.max(s, axis=-1, keepdims=True)
        p = jnp.exp(s)
        p = p * pl.reciprocal(jnp.sum(p, axis=-1, keepdims=True), approx=True)

        o_h = jnp.dot(p.astype(jnp.bfloat16), v_h,
                      preferred_element_type=jnp.float32)              # (L, dv)
        # accumulate directly into the output projection -> no concat, small live set
        attn = attn + jnp.dot(o_h.astype(jnp.bfloat16),
                              wfc_ref[h * d_v:(h + 1) * d_v, :],
                              preferred_element_type=jnp.float32)      # (L, D)

    y = _layernorm(attn + x, ln1_g_ref[...], ln1_b_ref[...])

    # --- position-wise feed forward -------------------------------------------
    h1 = jnp.dot(y.astype(jnp.bfloat16), w1_ref[...],
                 preferred_element_type=jnp.float32) + b1_ref[...]
    h1 = jnp.maximum(h1, 0.0)
    h2 = jnp.dot(h1.astype(jnp.bfloat16), w2_ref[...],
                 preferred_element_type=jnp.float32) + b2_ref[...]
    out_ref[0] = _layernorm(h2 + y, ln2_g_ref[...], ln2_b_ref[...])


# ----------------------------- wrappers ---------------------------------------

def prelude_call(x_sum, pos_slice, ln_g, ln_b):
    B, L, D = x_sum.shape
    return pl.pallas_call(
        _prelude_kernel,
        out_shape=jax.ShapeDtypeStruct((B, L, D), jnp.float32),
        grid=(B,),
        in_specs=[
            pl.BlockSpec((1, L, D), lambda b: (b, 0, 0)),
            pl.BlockSpec((L, D), lambda b: (0, 0)),
            pl.BlockSpec((1, D), lambda b: (0, 0)),
            pl.BlockSpec((1, D), lambda b: (0, 0)),
        ],
        out_specs=pl.BlockSpec((1, L, D), lambda b: (b, 0, 0)),
        compiler_params=pltpu.CompilerParams(dimension_semantics=("parallel",)),
    )(x_sum, pos_slice, ln_g, ln_b)


def decoder_layer_call(x, bias, layer_params, *, n_head, d_k, d_v, prelude=None):
    """One fused DecoderLayer. If `prelude` is given (pos_slice, ln_g, ln_b),
    the pos-enc add + first LayerNorm are fused in front of the layer."""
    B, L, D = x.shape
    (wq, wk, wv, wfc, ln1_g, ln1_b, w1, b1, w2, b2, ln2_g, ln2_b) = layer_params
    d_inner = w1.shape[1]
    fuse = prelude is not None

    kernel = functools.partial(_decoder_layer_kernel, n_head=n_head, d_k=d_k,
                               d_v=d_v, fuse_prelude=fuse)

    def rep(shape):
        # weight / broadcast input replicated across the batch grid
        return pl.BlockSpec(shape, lambda b: (0,) * len(shape))

    in_specs = [
        pl.BlockSpec((1, L, D), lambda b: (b, 0, 0)),   # x
        pl.BlockSpec((1, L, L), lambda b: (b, 0, 0)),   # additive attention bias
    ]
    inputs = [x, bias]
    if fuse:
        pos_slice, g0, b0 = prelude
        in_specs += [rep((L, D)), rep((1, D)), rep((1, D))]
        inputs += [pos_slice, g0, b0]
    in_specs += [
        rep((D, n_head * d_k)),                          # wq  (bf16)
        rep((D, n_head * d_k)),                          # wk  (bf16)
        rep((D, n_head * d_v)),                          # wv  (bf16)
        rep((n_head * d_v, D)),                          # wfc (bf16)
        rep((1, D)), rep((1, D)),                        # ln1 gamma/beta (f32)
        rep((D, d_inner)), rep((1, d_inner)),            # w1 (bf16), b1 (f32)
        rep((d_inner, D)), rep((1, D)),                  # w2 (bf16), b2 (f32)
        rep((1, D)), rep((1, D)),                        # ln2 gamma/beta (f32)
    ]
    inputs += [wq, wk, wv, wfc, ln1_g, ln1_b, w1, b1, w2, b2, ln2_g, ln2_b]

    return pl.pallas_call(
        kernel,
        out_shape=jax.ShapeDtypeStruct((B, L, D), jnp.float32),
        grid=(B,),
        in_specs=in_specs,
        out_specs=pl.BlockSpec((1, L, D), lambda b: (b, 0, 0)),
        compiler_params=pltpu.CompilerParams(dimension_semantics=("parallel",)),
    )(*inputs)


# ----------------------------- parameter construction -------------------------

def init_params(key, *, d_word_vec, d_model, d_inner, n_layers, n_head, d_k, d_v,
                pad_idx, order_size, tile_size, num_primes, n_position):
    keys = jax.random.split(key, 16 + 8 * n_layers)
    ki = iter(range(len(keys)))

    def emb(k, vocab):
        t = jax.random.normal(keys[k], (vocab, d_word_vec), jnp.float32)
        return t.at[pad_idx].set(0.0)   # padding_idx row zeroed (nn.Embedding)

    def lin(k, fan_in, fan_out):
        return jax.random.normal(keys[k], (fan_in, fan_out), jnp.float32) * 0.05

    p = {}
    p["order_emb"] = emb(next(ki), order_size + 1)
    p["tile_embs"] = [emb(next(ki), tile_size + 1) for _ in range(num_primes)]
    p["sp_tile2_emb"] = emb(next(ki), tile_size + 1)
    p["pos_table"] = _sinusoid_table(n_position, d_word_vec)
    p["ln_g"] = jnp.ones((1, d_model), jnp.float32)
    p["ln_b"] = jnp.zeros((1, d_model), jnp.float32)

    layers = []
    for _ in range(n_layers):
        wq = lin(next(ki), d_model, n_head * d_k)
        wk = lin(next(ki), d_model, n_head * d_k)
        wv = lin(next(ki), d_model, n_head * d_v)
        wfc = lin(next(ki), n_head * d_v, d_model)
        w1 = lin(next(ki), d_model, d_inner)
        b1 = jax.random.normal(keys[next(ki)], (1, d_inner), jnp.float32) * 0.01
        w2 = lin(next(ki), d_inner, d_model)
        b2 = jax.random.normal(keys[next(ki)], (1, d_model), jnp.float32) * 0.01
        ln1_g = jnp.ones((1, d_model), jnp.float32)
        ln1_b = jnp.zeros((1, d_model), jnp.float32)
        ln2_g = jnp.ones((1, d_model), jnp.float32)
        ln2_b = jnp.zeros((1, d_model), jnp.float32)
        layers.append((wq, wk, wv, wfc, ln1_g, ln1_b, w1, b1, w2, b2, ln2_g, ln2_b))
    p["layers"] = layers
    return p


# ----------------------------- Decoder forward --------------------------------

def decoder_forward(params, trg_seq, trg_mask, *, n_head, d_k, d_v,
                    num_primes, d_model, scale_emb=False):
    B, L, _ = trg_seq.shape
    # embedding sums (gathers = glue in plain JAX)
    x = jnp.take(params["order_emb"], trg_seq[:, :, 0], axis=0)
    for i in range(num_primes):
        x = x + jnp.take(params["tile_embs"][i], trg_seq[:, :, i + 1], axis=0)
    x = x + jnp.take(params["sp_tile2_emb"], trg_seq[:, :, num_primes + 1], axis=0)
    if scale_emb:
        x = x * (d_model ** 0.5)
    # dropout = identity (eval).

    pos_slice = params["pos_table"][:L, :]
    if not params["layers"]:
        return prelude_call(x, pos_slice, params["ln_g"], params["ln_b"])

    # additive attention bias (0 keep / -1e9 mask), computed once, shared by layers
    bias = (1.0 - trg_mask.astype(jnp.float32)) * (-1e9)

    def to_bf16(lp):
        wq, wk, wv, wfc, ln1_g, ln1_b, w1, b1, w2, b2, ln2_g, ln2_b = lp
        bf = lambda w: w.astype(jnp.bfloat16)
        return (bf(wq), bf(wk), bf(wv), bf(wfc), ln1_g, ln1_b,
                bf(w1), b1, bf(w2), b2, ln2_g, ln2_b)

    for li, lp in enumerate(params["layers"]):
        prelude = (pos_slice, params["ln_g"], params["ln_b"]) if li == 0 else None
        x = decoder_layer_call(x, bias, to_bf16(lp),
                               n_head=n_head, d_k=d_k, d_v=d_v, prelude=prelude)
    return x


# ----------------------------- plain-JAX reference (full f32) -----------------

def decoder_forward_ref(params, trg_seq, trg_mask, *, n_head, d_k, d_v,
                        num_primes, d_model, scale_emb=False):
    B, L, _ = trg_seq.shape
    x = jnp.take(params["order_emb"], trg_seq[:, :, 0], axis=0)
    for i in range(num_primes):
        x = x + jnp.take(params["tile_embs"][i], trg_seq[:, :, i + 1], axis=0)
    x = x + jnp.take(params["sp_tile2_emb"], trg_seq[:, :, num_primes + 1], axis=0)
    if scale_emb:
        x = x * (d_model ** 0.5)
    x = x + params["pos_table"][None, :L, :]
    x = _layernorm(x, params["ln_g"], params["ln_b"])
    mask = trg_mask.astype(jnp.float32)[:, None, :, :]       # (B,1,L,L)
    for (wq, wk, wv, wfc, ln1_g, ln1_b, w1, b1, w2, b2, ln2_g, ln2_b) in params["layers"]:
        res = x
        q = (x @ wq).reshape(B, L, n_head, d_k).transpose(0, 2, 1, 3)
        k = (x @ wk).reshape(B, L, n_head, d_k).transpose(0, 2, 1, 3)
        v = (x @ wv).reshape(B, L, n_head, d_v).transpose(0, 2, 1, 3)
        s = jnp.einsum("bhqd,bhkd->bhqk", q, k) / (d_k ** 0.5)
        s = jnp.where(mask == 0.0, -1e9, s)
        p = jax.nn.softmax(s, axis=-1)
        o = jnp.einsum("bhqk,bhkd->bhqd", p, v).transpose(0, 2, 1, 3).reshape(B, L, -1)
        y = _layernorm(o @ wfc + res, ln1_g, ln1_b)
        h = jnp.maximum(y @ w1 + b1, 0.0)
        x = _layernorm(h @ w2 + b2 + y, ln2_g, ln2_b)
    return x


# ----------------------------- main -------------------------------------------

if __name__ == "__main__":
    # small config consistent with the module
    B, L = 2, 8
    d_word_vec = d_model = 32
    d_inner = 64
    n_layers = 2
    n_head = 2
    d_k = d_v = 16
    pad_idx = 0
    n_position = 200
    order_size = 4
    tile_size = 4
    num_primes = 1

    key = jax.random.PRNGKey(0)
    kp, ks = jax.random.split(key)
    params = init_params(kp, d_word_vec=d_word_vec, d_model=d_model,
                         d_inner=d_inner, n_layers=n_layers, n_head=n_head,
                         d_k=d_k, d_v=d_v, pad_idx=pad_idx,
                         order_size=order_size, tile_size=tile_size,
                         num_primes=num_primes, n_position=n_position)

    # trg_seq: [B, L, num_primes + 2] integer tokens
    trg_seq = jax.random.randint(ks, (B, L, num_primes + 2), 0, tile_size + 1,
                                 dtype=jnp.int32)
    # causal self-attention mask [B, L, L]
    trg_mask = jnp.tril(jnp.ones((L, L), jnp.float32))[None].repeat(B, axis=0)

    out = decoder_forward(params, trg_seq, trg_mask,
                          n_head=n_head, d_k=d_k, d_v=d_v,
                          num_primes=num_primes, d_model=d_model,
                          scale_emb=False)
    out = jax.block_until_ready(out)

    ref = decoder_forward_ref(params, trg_seq, trg_mask,
                              n_head=n_head, d_k=d_k, d_v=d_v,
                              num_primes=num_primes, d_model=d_model,
                              scale_emb=False)
    # bf16 matmuls + approximate softmax reciprocal -> looser tolerance vs f32 ref
    np.testing.assert_allclose(np.asarray(out), np.asarray(ref),
                               rtol=3e-2, atol=3e-2)

    print("KERNEL_OK")
</pallas_src>

<mosaic_0001>
module attributes {stable_mosaic.version = 11 : i64} {
  func.func @_decoder_layer_kernel(%arg0: i32, %arg1: memref<1x8x32xf32, #tpu.memory_space<vmem>>, %arg2: memref<1x8x8xf32, #tpu.memory_space<vmem>>, %arg3: memref<8x32xf32, #tpu.memory_space<vmem>>, %arg4: memref<1x32xf32, #tpu.memory_space<vmem>>, %arg5: memref<1x32xf32, #tpu.memory_space<vmem>>, %arg6: memref<32x32xbf16, #tpu.memory_space<vmem>>, %arg7: memref<32x32xbf16, #tpu.memory_space<vmem>>, %arg8: memref<32x32xbf16, #tpu.memory_space<vmem>>, %arg9: memref<32x32xbf16, #tpu.memory_space<vmem>>, %arg10: memref<1x32xf32, #tpu.memory_space<vmem>>, %arg11: memref<1x32xf32, #tpu.memory_space<vmem>>, %arg12: memref<32x64xbf16, #tpu.memory_space<vmem>>, %arg13: memref<1x64xf32, #tpu.memory_space<vmem>>, %arg14: memref<64x32xbf16, #tpu.memory_space<vmem>>, %arg15: memref<1x32xf32, #tpu.memory_space<vmem>>, %arg16: memref<1x32xf32, #tpu.memory_space<vmem>>, %arg17: memref<1x32xf32, #tpu.memory_space<vmem>>, %arg18: memref<1x8x32xf32, #tpu.memory_space<vmem>>) attributes {dimension_semantics = [#tpu.dimension_semantics<parallel>], iteration_bounds = array<i64: 2>, scalar_prefetch = 0 : i64, scratch_operands = 0 : i64, tpu.core_type = #tpu.core_type<tc>, window_params = [{transform_indices = @transform_0, window_bounds = array<i64: 1, 8, 32>}, {transform_indices = @transform_1, window_bounds = array<i64: 1, 8, 8>}, {pipeline_mode = #tpu.pipeline_mode<synchronous>, transform_indices = @transform_2, window_bounds = array<i64: 8, 32>}, {pipeline_mode = #tpu.pipeline_mode<synchronous>, transform_indices = @transform_3, window_bounds = array<i64: 1, 32>}, {pipeline_mode = #tpu.pipeline_mode<synchronous>, transform_indices = @transform_4, window_bounds = array<i64: 1, 32>}, {pipeline_mode = #tpu.pipeline_mode<synchronous>, transform_indices = @transform_5, window_bounds = array<i64: 32, 32>}, {pipeline_mode = #tpu.pipeline_mode<synchronous>, transform_indices = @transform_6, window_bounds = array<i64: 32, 32>}, {pipeline_mode = #tpu.pipeline_mode<synchronous>, transform_indices = @transform_7, window_bounds = array<i64: 32, 32>}, {pipeline_mode = #tpu.pipeline_mode<synchronous>, transform_indices = @transform_8, window_bounds = array<i64: 32, 32>}, {pipeline_mode = #tpu.pipeline_mode<synchronous>, transform_indices = @transform_9, window_bounds = array<i64: 1, 32>}, {pipeline_mode = #tpu.pipeline_mode<synchronous>, transform_indices = @transform_10, window_bounds = array<i64: 1, 32>}, {pipeline_mode = #tpu.pipeline_mode<synchronous>, transform_indices = @transform_11, window_bounds = array<i64: 32, 64>}, {pipeline_mode = #tpu.pipeline_mode<synchronous>, transform_indices = @transform_12, window_bounds = array<i64: 1, 64>}, {pipeline_mode = #tpu.pipeline_mode<synchronous>, transform_indices = @transform_13, window_bounds = array<i64: 64, 32>}, {pipeline_mode = #tpu.pipeline_mode<synchronous>, transform_indices = @transform_14, window_bounds = array<i64: 1, 32>}, {pipeline_mode = #tpu.pipeline_mode<synchronous>, transform_indices = @transform_15, window_bounds = array<i64: 1, 32>}, {pipeline_mode = #tpu.pipeline_mode<synchronous>, transform_indices = @transform_16, window_bounds = array<i64: 1, 32>}, {transform_indices = @transform_17, window_bounds = array<i64: 1, 8, 32>}]} {
    %c0 = arith.constant 0 : index
    %c0_0 = arith.constant 0 : index
    %c0_1 = arith.constant 0 : index
    %0 = vector.load %arg1[%c0, %c0_0, %c0_1] : memref<1x8x32xf32, #tpu.memory_space<vmem>>, vector<1x8x32xf32>
    %1 = vector.shape_cast %0 : vector<1x8x32xf32> to vector<8x32xf32>
    %c0_2 = arith.constant 0 : index
    %c0_3 = arith.constant 0 : index
    %2 = vector.load %arg3[%c0_2, %c0_3] : memref<8x32xf32, #tpu.memory_space<vmem>>, vector<8x32xf32>
    %3 = arith.addf %1, %2 : vector<8x32xf32>
    %c0_4 = arith.constant 0 : index
    %c0_5 = arith.constant 0 : index
    %4 = vector.load %arg4[%c0_4, %c0_5] : memref<1x32xf32, #tpu.memory_space<vmem>>, vector<1x32xf32>
    %c0_6 = arith.constant 0 : index
    %c0_7 = arith.constant 0 : index
    %5 = vector.load %arg5[%c0_6, %c0_7] : memref<1x32xf32, #tpu.memory_space<vmem>>, vector<1x32xf32>
    %cst = arith.constant dense<0.000000e+00> : vector<8xf32>
    %6 = vector.multi_reduction <add>, %3, %cst [1] : vector<8x32xf32> to vector<8xf32>
    %7 = vector.shape_cast %6 : vector<8xf32> to vector<8x1xf32>
    %cst_8 = arith.constant 3.200000e+01 : f32
    %8 = vector.broadcast %cst_8 : f32 to vector<8x1xf32>
    %9 = arith.divf %7, %8 : vector<8x1xf32>
    %10 = vector.broadcast %9 : vector<8x1xf32> to vector<8x32xf32>
    %11 = arith.subf %3, %10 : vector<8x32xf32>
    %12 = arith.mulf %11, %11 : vector<8x32xf32>
    %cst_9 = arith.constant dense<0.000000e+00> : vector<8xf32>
    %13 = vector.multi_reduction <add>, %12, %cst_9 [1] : vector<8x32xf32> to vector<8xf32>
    %14 = vector.shape_cast %13 : vector<8xf32> to vector<8x1xf32>
    %cst_10 = arith.constant 3.200000e+01 : f32
    %15 = vector.broadcast %cst_10 : f32 to vector<8x1xf32>
    %16 = arith.divf %14, %15 : vector<8x1xf32>
    %17 = vector.broadcast %9 : vector<8x1xf32> to vector<8x32xf32>
    %18 = arith.subf %3, %17 : vector<8x32xf32>
    %cst_11 = arith.constant 9.99999997E-7 : f32
    %19 = vector.broadcast %cst_11 : f32 to vector<8x1xf32>
    %20 = arith.addf %16, %19 : vector<8x1xf32>
    %21 = math.rsqrt %20 : vector<8x1xf32>
    %22 = vector.broadcast %21 : vector<8x1xf32> to vector<8x32xf32>
    %23 = arith.mulf %18, %22 : vector<8x32xf32>
    %24 = vector.broadcast %4 : vector<1x32xf32> to vector<8x32xf32>
    %25 = arith.mulf %23, %24 : vector<8x32xf32>
    %26 = vector.broadcast %5 : vector<1x32xf32> to vector<8x32xf32>
    %27 = arith.addf %25, %26 : vector<8x32xf32>
    %c0_12 = arith.constant 0 : index
    %c0_13 = arith.constant 0 : index
    %c0_14 = arith.constant 0 : index
    %28 = vector.load %arg2[%c0_12, %c0_13, %c0_14] : memref<1x8x8xf32, #tpu.memory_space<vmem>>, vector<1x8x8xf32>
    %29 = vector.shape_cast %28 : vector<1x8x8xf32> to vector<8x8xf32>
    %30 = arith.truncf %27 : vector<8x32xf32> to vector<8x32xbf16>
    %c0_15 = arith.constant 0 : index
    %c0_16 = arith.constant 0 : index
    %31 = vector.load %arg6[%c0_15, %c0_16] : memref<32x32xbf16, #tpu.memory_space<vmem>>, vector<32x32xbf16>
    %cst_17 = arith.constant dense<0.000000e+00> : vector<8x32xf32>
    %32 = tpu.matmul %30, %31, %cst_17 {dimension_numbers = #tpu.dot_dimension_numbers<[1], [0], [0], [1], [0, 0, 1, 1], [], []>} : vector<8x32xbf16>, vector<32x32xbf16>, vector<8x32xf32> -> vector<8x32xf32>
    %c0_18 = arith.constant 0 : index
    %c0_19 = arith.constant 0 : index
    %33 = vector.load %arg7[%c0_18, %c0_19] : memref<32x32xbf16, #tpu.memory_space<vmem>>, vector<32x32xbf16>
    %cst_20 = arith.constant dense<0.000000e+00> : vector<8x32xf32>
    %34 = tpu.matmul %30, %33, %cst_20 {dimension_numbers = #tpu.dot_dimension_numbers<[1], [0], [0], [1], [0, 0, 1, 1], [], []>} : vector<8x32xbf16>, vector<32x32xbf16>, vector<8x32xf32> -> vector<8x32xf32>
    %c0_21 = arith.constant 0 : index
    %c0_22 = arith.constant 0 : index
    %35 = vector.load %arg8[%c0_21, %c0_22] : memref<32x32xbf16, #tpu.memory_space<vmem>>, vector<32x32xbf16>
    %cst_23 = arith.constant dense<0.000000e+00> : vector<8x32xf32>
    %36 = tpu.matmul %30, %35, %cst_23 {dimension_numbers = #tpu.dot_dimension_numbers<[1], [0], [0], [1], [0, 0, 1, 1], [], []>} : vector<8x32xbf16>, vector<32x32xbf16>, vector<8x32xf32> -> vector<8x32xf32>
    %cst_24 = arith.constant 2.500000e-01 : f32
    %37 = vector.broadcast %cst_24 : f32 to vector<8x32xf32>
    %38 = arith.mulf %32, %37 : vector<8x32xf32>
    %cst_25 = arith.constant 0.000000e+00 : f32
    %39 = vector.broadcast %cst_25 : f32 to vector<8x32xf32>
    %40 = vector.extract_strided_slice %38 {offsets = [0, 0], sizes = [8, 16], strides = [1, 1]} : vector<8x32xf32> to vector<8x16xf32>
    %41 = arith.truncf %40 : vector<8x16xf32> to vector<8x16xbf16>
    %42 = vector.extract_strided_slice %34 {offsets = [0, 0], sizes = [8, 16], strides = [1, 1]} : vector<8x32xf32> to vector<8x16xf32>
    %43 = arith.truncf %42 : vector<8x16xf32> to vector<8x16xbf16>
    %44 = vector.extract_strided_slice %36 {offsets = [0, 0], sizes = [8, 16], strides = [1, 1]} : vector<8x32xf32> to vector<8x16xf32>
    %45 = arith.truncf %44 : vector<8x16xf32> to vector<8x16xbf16>
    %cst_26 = arith.constant dense<0.000000e+00> : vector<8x8xf32>
    %46 = tpu.matmul %41, %43, %cst_26 {dimension_numbers = #tpu.dot_dimension_numbers<[1], [1], [0], [0], [0, 0, 1, 0], [], []>} : vector<8x16xbf16>, vector<8x16xbf16>, vector<8x8xf32> -> vector<8x8xf32>
    %47 = arith.addf %46, %29 : vector<8x8xf32>
    %cst_27 = arith.constant dense<0xFF800000> : vector<8xf32>
    %48 = vector.multi_reduction <maximumf>, %47, %cst_27 [1] : vector<8x8xf32> to vector<8xf32>
    %49 = vector.shape_cast %48 : vector<8xf32> to vector<8x1xf32>
    %50 = vector.broadcast %49 : vector<8x1xf32> to vector<8x8xf32>
    %51 = arith.subf %47, %50 : vector<8x8xf32>
    %52 = math.exp %51 : vector<8x8xf32>
    %cst_28 = arith.constant dense<0.000000e+00> : vector<8xf32>
    %53 = vector.multi_reduction <add>, %52, %cst_28 [1] : vector<8x8xf32> to vector<8xf32>
    %54 = vector.shape_cast %53 : vector<8xf32> to vector<8x1xf32>
    %55 = tpu.reciprocal %54 {approx = true} : vector<8x1xf32> -> vector<8x1xf32>
    %56 = vector.broadcast %55 : vector<8x1xf32> to vector<8x8xf32>
    %57 = arith.mulf %52, %56 : vector<8x8xf32>
    %58 = arith.truncf %57 : vector<8x8xf32> to vector<8x8xbf16>
    %cst_29 = arith.constant dense<0.000000e+00> : vector<8x16xf32>
    %59 = tpu.matmul %58, %45, %cst_29 {dimension_numbers = #tpu.dot_dimension_numbers<[1], [0], [0], [1], [0, 0, 1, 1], [], []>} : vector<8x8xbf16>, vector<8x16xbf16>, vector<8x16xf32> -> vector<8x16xf32>
    %60 = arith.truncf %59 : vector<8x16xf32> to vector<8x16xbf16>
    %c0_30 = arith.constant 0 : index
    %c0_31 = arith.constant 0 : index
    %61 = vector.load %arg9[%c0_30, %c0_31] : memref<32x32xbf16, #tpu.memory_space<vmem>>, vector<16x32xbf16>
    %cst_32 = arith.constant dense<0.000000e+00> : vector<8x32xf32>
    %62 = tpu.matmul %60, %61, %cst_32 {dimension_numbers = #tpu.dot_dimension_numbers<[1], [0], [0], [1], [0, 0, 1, 1], [], []>} : vector<8x16xbf16>, vector<16x32xbf16>, vector<8x32xf32> -> vector<8x32xf32>
    %63 = arith.addf %39, %62 : vector<8x32xf32>
    %64 = vector.extract_strided_slice %38 {offsets = [0, 16], sizes = [8, 16], strides = [1, 1]} : vector<8x32xf32> to vector<8x16xf32>
    %65 = arith.truncf %64 : vector<8x16xf32> to vector<8x16xbf16>
    %66 = vector.extract_strided_slice %34 {offsets = [0, 16], sizes = [8, 16], strides = [1, 1]} : vector<8x32xf32> to vector<8x16xf32>
    %67 = arith.truncf %66 : vector<8x16xf32> to vector<8x16xbf16>
    %68 = vector.extract_strided_slice %36 {offsets = [0, 16], sizes = [8, 16], strides = [1, 1]} : vector<8x32xf32> to vector<8x16xf32>
    %69 = arith.truncf %68 : vector<8x16xf32> to vector<8x16xbf16>
    %cst_33 = arith.constant dense<0.000000e+00> : vector<8x8xf32>
    %70 = tpu.matmul %65, %67, %cst_33 {dimension_numbers = #tpu.dot_dimension_numbers<[1], [1], [0], [0], [0, 0, 1, 0], [], []>} : vector<8x16xbf16>, vector<8x16xbf16>, vector<8x8xf32> -> vector<8x8xf32>
    %71 = arith.addf %70, %29 : vector<8x8xf32>
    %cst_34 = arith.constant dense<0xFF800000> : vector<8xf32>
    %72 = vector.multi_reduction <maximumf>, %71, %cst_34 [1] : vector<8x8xf32> to vector<8xf32>
    %73 = vector.shape_cast %72 : vector<8xf32> to vector<8x1xf32>
    %74 = vector.broadcast %73 : vector<8x1xf32> to vector<8x8xf32>
    %75 = arith.subf %71, %74 : vector<8x8xf32>
    %76 = math.exp %75 : vector<8x8xf32>
    %cst_35 = arith.constant dense<0.000000e+00> : vector<8xf32>
    %77 = vector.multi_reduction <add>, %76, %cst_35 [1] : vector<8x8xf32> to vector<8xf32>
    %78 = vector.shape_cast %77 : vector<8xf32> to vector<8x1xf32>
    %79 = tpu.reciprocal %78 {approx = true} : vector<8x1xf32> -> vector<8x1xf32>
    %80 = vector.broadcast %79 : vector<8x1xf32> to vector<8x8xf32>
    %81 = arith.mulf %76, %80 : vector<8x8xf32>
    %82 = arith.truncf %81 : vector<8x8xf32> to vector<8x8xbf16>
    %cst_36 = arith.constant dense<0.000000e+00> : vector<8x16xf32>
    %83 = tpu.matmul %82, %69, %cst_36 {dimension_numbers = #tpu.dot_dimension_numbers<[1], [0], [0], [1], [0, 0, 1, 1], [], []>} : vector<8x8xbf16>, vector<8x16xbf16>, vector<8x16xf32> -> vector<8x16xf32>
    %84 = arith.truncf %83 : vector<8x16xf32> to vector<8x16xbf16>
    %c16 = arith.constant 16 : index
    %c0_37 = arith.constant 0 : index
    %85 = vector.load %arg9[%c16, %c0_37] : memref<32x32xbf16, #tpu.memory_space<vmem>>, vector<16x32xbf16>
    %cst_38 = arith.constant dense<0.000000e+00> : vector<8x32xf32>
    %86 = tpu.matmul %84, %85, %cst_38 {dimension_numbers = #tpu.dot_dimension_numbers<[1], [0], [0], [1], [0, 0, 1, 1], [], []>} : vector<8x16xbf16>, vector<16x32xbf16>, vector<8x32xf32> -> vector<8x32xf32>
    %87 = arith.addf %63, %86 : vector<8x32xf32>
    %88 = arith.addf %87, %27 : vector<8x32xf32>
    %c0_39 = arith.constant 0 : index
    %c0_40 = arith.constant 0 : index
    %89 = vector.load %arg10[%c0_39, %c0_40] : memref<1x32xf32, #tpu.memory_space<vmem>>, vector<1x32xf32>
    %c0_41 = arith.constant 0 : index
    %c0_42 = arith.constant 0 : index
    %90 = vector.load %arg11[%c0_41, %c0_42] : memref<1x32xf32, #tpu.memory_space<vmem>>, vector<1x32xf32>
    %cst_43 = arith.constant dense<0.000000e+00> : vector<8xf32>
    %91 = vector.multi_reduction <add>, %88, %cst_43 [1] : vector<8x32xf32> to vector<8xf32>
    %92 = vector.shape_cast %91 : vector<8xf32> to vector<8x1xf32>
    %cst_44 = arith.constant 3.200000e+01 : f32
    %93 = vector.broadcast %cst_44 : f32 to vector<8x1xf32>
    %94 = arith.divf %92, %93 : vector<8x1xf32>
    %95 = vector.broadcast %94 : vector<8x1xf32> to vector<8x32xf32>
    %96 = arith.subf %88, %95 : vector<8x32xf32>
    %97 = arith.mulf %96, %96 : vector<8x32xf32>
    %cst_45 = arith.constant dense<0.000000e+00> : vector<8xf32>
    %98 = vector.multi_reduction <add>, %97, %cst_45 [1] : vector<8x32xf32> to vector<8xf32>
    %99 = vector.shape_cast %98 : vector<8xf32> to vector<8x1xf32>
    %cst_46 = arith.constant 3.200000e+01 : f32
    %100 = vector.broadcast %cst_46 : f32 to vector<8x1xf32>
    %101 = arith.divf %99, %100 : vector<8x1xf32>
    %102 = vector.broadcast %94 : vector<8x1xf32> to vector<8x32xf32>
    %103 = arith.subf %88, %102 : vector<8x32xf32>
    %cst_47 = arith.constant 9.99999997E-7 : f32
    %104 = vector.broadcast %cst_47 : f32 to vector<8x1xf32>
    %105 = arith.addf %101, %104 : vector<8x1xf32>
    %106 = math.rsqrt %105 : vector<8x1xf32>
    %107 = vector.broadcast %106 : vector<8x1xf32> to vector<8x32xf32>
    %108 = arith.mulf %103, %107 : vector<8x32xf32>
    %109 = vector.broadcast %89 : vector<1x32xf32> to vector<8x32xf32>
    %110 = arith.mulf %108, %109 : vector<8x32xf32>
    %111 = vector.broadcast %90 : vector<1x32xf32> to vector<8x32xf32>
    %112 = arith.addf %110, %111 : vector<8x32xf32>
    %113 = arith.truncf %112 : vector<8x32xf32> to vector<8x32xbf16>
    %c0_48 = arith.constant 0 : index
    %c0_49 = arith.constant 0 : index
    %114 = vector.load %arg12[%c0_48, %c0_49] : memref<32x64xbf16, #tpu.memory_space<vmem>>, vector<32x64xbf16>
    %cst_50 = arith.constant dense<0.000000e+00> : vector<8x64xf32>
    %115 = tpu.matmul %113, %114, %cst_50 {dimension_numbers = #tpu.dot_dimension_numbers<[1], [0], [0], [1], [0, 0, 1, 1], [], []>} : vector<8x32xbf16>, vector<32x64xbf16>, vector<8x64xf32> -> vector<8x64xf32>
    %c0_51 = arith.constant 0 : index
    %c0_52 = arith.constant 0 : index
    %116 = vector.load %arg13[%c0_51, %c0_52] : memref<1x64xf32, #tpu.memory_space<vmem>>, vector<1x64xf32>
    %117 = vector.broadcast %116 : vector<1x64xf32> to vector<8x64xf32>
    %118 = arith.addf %115, %117 : vector<8x64xf32>
    %cst_53 = arith.constant 0.000000e+00 : f32
    %119 = vector.broadcast %cst_53 : f32 to vector<8x64xf32>
    %120 = arith.maximumf %118, %119 : vector<8x64xf32>
    %121 = arith.truncf %120 : vector<8x64xf32> to vector<8x64xbf16>
    %c0_54 = arith.constant 0 : index
    %c0_55 = arith.constant 0 : index
    %122 = vector.load %arg14[%c0_54, %c0_55] : memref<64x32xbf16, #tpu.memory_space<vmem>>, vector<64x32xbf16>
    %cst_56 = arith.constant dense<0.000000e+00> : vector<8x32xf32>
    %123 = tpu.matmul %121, %122, %cst_56 {dimension_numbers = #tpu.dot_dimension_numbers<[1], [0], [0], [1], [0, 0, 1, 1], [], []>} : vector<8x64xbf16>, vector<64x32xbf16>, vector<8x32xf32> -> vector<8x32xf32>
    %c0_57 = arith.constant 0 : index
    %c0_58 = arith.constant 0 : index
    %124 = vector.load %arg15[%c0_57, %c0_58] : memref<1x32xf32, #tpu.memory_space<vmem>>, vector<1x32xf32>
    %125 = vector.broadcast %124 : vector<1x32xf32> to vector<8x32xf32>
    %126 = arith.addf %123, %125 : vector<8x32xf32>
    %127 = arith.addf %126, %112 : vector<8x32xf32>
    %c0_59 = arith.constant 0 : index
    %c0_60 = arith.constant 0 : index
    %128 = vector.load %arg16[%c0_59, %c0_60] : memref<1x32xf32, #tpu.memory_space<vmem>>, vector<1x32xf32>
    %c0_61 = arith.constant 0 : index
    %c0_62 = arith.constant 0 : index
    %129 = vector.load %arg17[%c0_61, %c0_62] : memref<1x32xf32, #tpu.memory_space<vmem>>, vector<1x32xf32>
    %cst_63 = arith.constant dense<0.000000e+00> : vector<8xf32>
    %130 = vector.multi_reduction <add>, %127, %cst_63 [1] : vector<8x32xf32> to vector<8xf32>
    %131 = vector.shape_cast %130 : vector<8xf32> to vector<8x1xf32>
    %cst_64 = arith.constant 3.200000e+01 : f32
    %132 = vector.broadcast %cst_64 : f32 to vector<8x1xf32>
    %133 = arith.divf %131, %132 : vector<8x1xf32>
    %134 = vector.broadcast %133 : vector<8x1xf32> to vector<8x32xf32>
    %135 = arith.subf %127, %134 : vector<8x32xf32>
    %136 = arith.mulf %135, %135 : vector<8x32xf32>
    %cst_65 = arith.constant dense<0.000000e+00> : vector<8xf32>
    %137 = vector.multi_reduction <add>, %136, %cst_65 [1] : vector<8x32xf32> to vector<8xf32>
    %138 = vector.shape_cast %137 : vector<8xf32> to vector<8x1xf32>
    %cst_66 = arith.constant 3.200000e+01 : f32
    %139 = vector.broadcast %cst_66 : f32 to vector<8x1xf32>
    %140 = arith.divf %138, %139 : vector<8x1xf32>
    %141 = vector.broadcast %133 : vector<8x1xf32> to vector<8x32xf32>
    %142 = arith.subf %127, %141 : vector<8x32xf32>
    %cst_67 = arith.constant 9.99999997E-7 : f32
    %143 = vector.broadcast %cst_67 : f32 to vector<8x1xf32>
    %144 = arith.addf %140, %143 : vector<8x1xf32>
    %145 = math.rsqrt %144 : vector<8x1xf32>
    %146 = vector.broadcast %145 : vector<8x1xf32> to vector<8x32xf32>
    %147 = arith.mulf %142, %146 : vector<8x32xf32>
    %148 = vector.broadcast %128 : vector<1x32xf32> to vector<8x32xf32>
    %149 = arith.mulf %147, %148 : vector<8x32xf32>
    %150 = vector.broadcast %129 : vector<1x32xf32> to vector<8x32xf32>
    %151 = arith.addf %149, %150 : vector<8x32xf32>
    %c0_68 = arith.constant 0 : index
    %c0_69 = arith.constant 0 : index
    %c0_70 = arith.constant 0 : index
    %152 = vector.load %arg18[%c0_68, %c0_69, %c0_70] : memref<1x8x32xf32, #tpu.memory_space<vmem>>, vector<1x8x32xf32>
    %153 = vector.shape_cast %152 : vector<1x8x32xf32> to vector<8x32xf32>
    %154 = vector.shape_cast %151 : vector<8x32xf32> to vector<1x8x32xf32>
    tpu.vector_store %arg18[%c0_68, %c0_69, %c0_70], %154 {strides = array<i32>} : memref<1x8x32xf32, #tpu.memory_space<vmem>>, vector<1x8x32xf32>,
    return
  }
  func.func @transform_0(%arg0: i32) -> (i32, i32, i32) {
    %c0_i32 = arith.constant 0 : i32
    %c0_i32_0 = arith.constant 0 : i32
    %c0_i32_1 = arith.constant 0 : i32
    return %arg0, %c0_i32, %c0_i32_0 : i32, i32, i32
  }
  func.func @transform_1(%arg0: i32) -> (i32, i32, i32) {
    %c0_i32 = arith.constant 0 : i32
    %c0_i32_0 = arith.constant 0 : i32
    %c0_i32_1 = arith.constant 0 : i32
    return %arg0, %c0_i32, %c0_i32_0 : i32, i32, i32
  }
  func.func @transform_2(%arg0: i32) -> (i32, i32) {
    %c0_i32 = arith.constant 0 : i32
    %c0_i32_0 = arith.constant 0 : i32
    %c0_i32_1 = arith.constant 0 : i32
    return %c0_i32, %c0_i32_0 : i32, i32
  }
  func.func @transform_3(%arg0: i32) -> (i32, i32) {
    %c0_i32 = arith.constant 0 : i32
    %c0_i32_0 = arith.constant 0 : i32
    %c0_i32_1 = arith.constant 0 : i32
    return %c0_i32, %c0_i32_0 : i32, i32
  }
  func.func @transform_4(%arg0: i32) -> (i32, i32) {
    %c0_i32 = arith.constant 0 : i32
    %c0_i32_0 = arith.constant 0 : i32
    %c0_i32_1 = arith.constant 0 : i32
    return %c0_i32, %c0_i32_0 : i32, i32
  }
  func.func @transform_5(%arg0: i32) -> (i32, i32) {
    %c0_i32 = arith.constant 0 : i32
    %c0_i32_0 = arith.constant 0 : i32
    %c0_i32_1 = arith.constant 0 : i32
    return %c0_i32, %c0_i32_0 : i32, i32
  }
  func.func @transform_6(%arg0: i32) -> (i32, i32) {
    %c0_i32 = arith.constant 0 : i32
    %c0_i32_0 = arith.constant 0 : i32
    %c0_i32_1 = arith.constant 0 : i32
    return %c0_i32, %c0_i32_0 : i32, i32
  }
  func.func @transform_7(%arg0: i32) -> (i32, i32) {
    %c0_i32 = arith.constant 0 : i32
    %c0_i32_0 = arith.constant 0 : i32
    %c0_i32_1 = arith.constant 0 : i32
    return %c0_i32, %c0_i32_0 : i32, i32
  }
  func.func @transform_8(%arg0: i32) -> (i32, i32) {
    %c0_i32 = arith.constant 0 : i32
    %c0_i32_0 = arith.constant 0 : i32
    %c0_i32_1 = arith.constant 0 : i32
    return %c0_i32, %c0_i32_0 : i32, i32
  }
  func.func @transform_9(%arg0: i32) -> (i32, i32) {
    %c0_i32 = arith.constant 0 : i32
    %c0_i32_0 = arith.constant 0 : i32
    %c0_i32_1 = arith.constant 0 : i32
    return %c0_i32, %c0_i32_0 : i32, i32
  }
  func.func @transform_10(%arg0: i32) -> (i32, i32) {
    %c0_i32 = arith.constant 0 : i32
    %c0_i32_0 = arith.constant 0 : i32
    %c0_i32_1 = arith.constant 0 : i32
    return %c0_i32, %c0_i32_0 : i32, i32
  }
  func.func @transform_11(%arg0: i32) -> (i32, i32) {
    %c0_i32 = arith.constant 0 : i32
    %c0_i32_0 = arith.constant 0 : i32
    %c0_i32_1 = arith.constant 0 : i32
    return %c0_i32, %c0_i32_0 : i32, i32
  }
  func.func @transform_12(%arg0: i32) -> (i32, i32) {
    %c0_i32 = arith.constant 0 : i32
    %c0_i32_0 = arith.constant 0 : i32
    %c0_i32_1 = arith.constant 0 : i32
    return %c0_i32, %c0_i32_0 : i32, i32
  }
  func.func @transform_13(%arg0: i32) -> (i32, i32) {
    %c0_i32 = arith.constant 0 : i32
    %c0_i32_0 = arith.constant 0 : i32
    %c0_i32_1 = arith.constant 0 : i32
    return %c0_i32, %c0_i32_0 : i32, i32
  }
  func.func @transform_14(%arg0: i32) -> (i32, i32) {
    %c0_i32 = arith.constant 0 : i32
    %c0_i32_0 = arith.constant 0 : i32
    %c0_i32_1 = arith.constant 0 : i32
    return %c0_i32, %c0_i32_0 : i32, i32
  }
  func.func @transform_15(%arg0: i32) -> (i32, i32) {
    %c0_i32 = arith.constant 0 : i32
    %c0_i32_0 = arith.constant 0 : i32
    %c0_i32_1 = arith.constant 0 : i32
    return %c0_i32, %c0_i32_0 : i32, i32
  }
  func.func @transform_16(%arg0: i32) -> (i32, i32) {
    %c0_i32 = arith.constant 0 : i32
    %c0_i32_0 = arith.constant 0 : i32
    %c0_i32_1 = arith.constant 0 : i32
    return %c0_i32, %c0_i32_0 : i32, i32
  }
  func.func @transform_17(%arg0: i32) -> (i32, i32, i32) {
    %c0_i32 = arith.constant 0 : i32
    %c0_i32_0 = arith.constant 0 : i32
    %c0_i32_1 = arith.constant 0 : i32
    return %arg0, %c0_i32, %c0_i32_0 : i32, i32, i32
  }
}

</mosaic_0001>

<bundles_post_ra>
// kernel: tpu_custom_call.1
= control target key start
LH: loop header
LB: loop body
LE: loop exit
PB: predicated region body
PF: predicated region fallthrough
CT: control target
= control target key end

     0   :  { %s2012_s0 = inlined_call_operand.vmem [shape: f32[2,8,32], index: 0, kind: input, shape index: {}]   ;;  %s2013_s1 = inlined_call_operand.vmem [shape: f32[2,8,8], index: 1, kind: input, shape index: {}]   ;;  %s2014_s2 = inlined_call_operand.hbm [shape: f32[8,32], index: 2, kind: input, shape index: {}]   ;;  %s2015_s3 = inlined_call_operand.vmem [shape: f32[1,32], index: 3, kind: input, shape index: {}]   ;;  %s2016_s4 = inlined_call_operand.vmem [shape: f32[1,32], index: 4, kind: input, shape index: {}]   ;;  %s2017_s5 = inlined_call_operand.vmem [shape: bf16[32,32], index: 5, kind: input, shape index: {}]   ;;  %s2018_s6 = inlined_call_operand.hbm [shape: bf16[32,32], index: 6, kind: input, shape index: {}]   ;;  %s2019_s7 = inlined_call_operand.hbm [shape: bf16[32,32], index: 7, kind: input, shape index: {}]   ;;  %s2020_s8 = inlined_call_operand.hbm [shape: bf16[32,32], index: 8, kind: input, shape index: {}]   ;;  %s2021_s9 = inlined_call_operand.vmem [shape: f32[1,32], index: 9, kind: input, shape index: {}]   ;;  %s2022_s10 = inlined_call_operand.vmem [shape: f32[1,32], index: 10, kind: input, shape index: {}]   ;;  %s2023_s11 = inlined_call_operand.hbm [shape: bf16[32,64], index: 11, kind: input, shape index: {}]   ;;  %s2024_s12 = inlined_call_operand.vmem [shape: f32[1,64], index: 12, kind: input, shape index: {}]   ;;  %s2025_s13 = inlined_call_operand.vmem [shape: bf16[64,32], index: 13, kind: input, shape index: {}]   ;;  %s2026_s14 = inlined_call_operand.vmem [shape: f32[1,32], index: 14, kind: input, shape index: {}]   ;;  %s2027_s15 = inlined_call_operand.vmem [shape: f32[1,32], index: 15, kind: input, shape index: {}]   ;;  %s2028_s16 = inlined_call_operand.vmem [shape: f32[1,32], index: 16, kind: input, shape index: {}]   ;;  %s2029_s17 = inlined_call_operand.hbm [shape: f32[2,8,32], index: 17, kind: output, shape index: {}]  }
   0x1   :  { %2039 = sst [smem:[#allocation23_spill]] %s2012_s0 }
   0x2   :  { %2040 = sst [smem:[#allocation24_spill]] %s2013_s1 }
   0x3   :  { %2041 = sst [smem:[#allocation25_spill]] %s2018_s6 }
   0x4   :  { %2042 = sst [smem:[#allocation26_spill]] %s2020_s8 }
   0x5   :  { %2043 = sst [smem:[#allocation27_spill]] %s2028_s16 }
   0x6   :  { %2044 = sst [smem:[#allocation28_spill]] %s2029_s17 }
   0x7   :  { %22 = vsyncpa [#allocation3], 0 }
   0x8   :  { %23 = vsyncpa [#allocation6], 0 }
   0x9   :  { %24 = vsyncpa [#allocation9], 0 }
   0xa   :  { %25 = vsyncpa [#allocation4], 0 }
   0xb   :  { %27 = vsyncpa [#allocation4 + $0x1], 0  ;;  %s1785_s24 = smov 0   ;;  %s1787_s25 = smov 0  }
   0xc   :  { %s1789_s26 = smov 0   ;;  %s1791_s27 = smov 0  }
   0xd LB: > { %2045 = sst [smem:[#allocation16_spill]] %s1672_s24  ;;  %s1806_s28 = sadd.s32 4294967295, %s1684_s27   ;;  %s1684_s27 = sphi %s1791_s27, %s2067_s27   ;;  %s1680_s26 = sphi %s1789_s26, %s2069_s26   ;;  %s1676_s25 = sphi %s1787_s25, %s2071_s25   ;;  %s1672_s24 = sphi %s1785_s24, %s2070_s24  }
   0xe   : > { %2046 = sst [smem:[#allocation17_spill]] %s1680_s26  ;;  %s1240_s29 = sadd.s32 4294967294, %s1684_s27  }
   0xf   : > { %2047 = sst [smem:[#allocation18_spill]] %s1684_s27  ;;  %s1810_s0 = sadd.s32 1, %s1684_s27  }
  0x10   : > { %2048 = sst [smem:[#allocation19_spill]] %s1810_s0  ;;  %s407_s30 = sadd.s32 1, %s1680_s26 }
  0x11   : > { %s404_s18 = ssub.s32 %s1684_s27, %s1810_s0  ;;  %p417_p0 = scmp.ne.s32.totalorder %s1680_s26, %s1676_s25 }
  0x12   : > { %p405_p1 = scmp.eq.s32.totalorder %s404_s18, 0  ;;  %p418_p2 = scmp.eq.s32.totalorder %s1806_s28, 1 }
  0x13   : > { %p423_p3 = scmp.ne.s32.totalorder %s1676_s25, %s1672_s24  ;;  %p424_p4 = scmp.eq.s32.totalorder %s1240_s29, 1 }
  0x14   : > { %s1821_s19 = scalar_select %p405_p1, %s1680_s26, %s407_s30  }
  0x15   : > { %p1823_p5 = por %p418_p2, %p417_p0  ;;  %p1827_p6 = por %p424_p4, %p423_p3 }
  0x16   : > { %2049 = sst [smem:[#allocation20_spill]] %s1821_s19  ;;  %p1241_p7 = scmp.ge.s32.totalorder %s1684_s27, 1 }
  0x17   : > { %s2050_s1 = scalar_select %p1823_p5, 1, 0 }
  0x18   : > { %s2052_s20 = scalar_select %p1827_p6, 1, 0 }
  0x19   : > { %2051 = sst [smem:[#allocation21_spill]] %s2050_s1  ;;  %p431_p8 = scmp.lt.s32.totalorder %s1684_s27, 3 }
  0x1a   : > { %2053 = sst [smem:[#allocation22_spill]] %s2052_s20  ;;  %p1384_p9 = scmp.eq.s32.totalorder %s1806_s28, 0 }
  0x1b   : > { %p1834_p10 = pnand %p1241_p7, %p431_p8  ;;  %s2055_s6 = sld [smem:[#allocation25_spill]] }
  0x1c   : > { %s1686_s30 = smov [#allocation5]   ;;  %s2057_s8 = sld [smem:[#allocation26_spill]] }
  0x1d   : > { %p1364_p11 = pneg %p1834_p10  ;;  %s465_s18 = sshll.u32 %s1686_s30, 4  ;;  %s466_s18 = int_to_ptr.vmem [resolvable:$true] %s465_s18 }
  0x1e   : > { %s1687_s22 = smov 64   ;;  %s1688_s23 = smov 4  }
  0x1f   : > { %p1845_p12 = pnand %p1384_p9, %p1364_p11  ;;  %s443_s16 = sshll.u32 %s2014_s2, 4  ;;  %s444_s16 = int_to_ptr.hbm [resolvable:$true] %s443_s16 }
  0x20   : > { %s1690_s1 = smov [#allocation2]   ;;  %s511_s27 = sshll.u32 %s2023_s11, 4  ;;  %s512_s27 = int_to_ptr.hbm [resolvable:$true] %s511_s27 }
  0x21   : > { %s463_s29 = sshll.u32 %s2055_s6, 4  ;;  %s1689_s6 = smov [#allocation8]   ;;  %s464_s29 = int_to_ptr.hbm [resolvable:$true] %s463_s29 }
  0x22   : > { %s491_s20 = sshll.u32 %s2057_s8, 4  ;;  %s493_s30 = sshll.u32 %s1689_s6, 4  ;;  %s492_s20 = int_to_ptr.hbm [resolvable:$true] %s491_s20  ;;  %s494_s30 = int_to_ptr.vmem [resolvable:$true] %s493_s30 }
  0x23   : > { %1370 = dma.hbm_to_vmem [thread:$0]  (!%p1845_p12), %s464_s29, 256, %s466_s18, [#allocation6], %s1687_s22, %s1687_s22, %s1688_s23  }
  0x24   : > { %1376 = dma.hbm_to_vmem [thread:$0]  (!%p1845_p12), %s492_s20, 256, %s494_s30, [#allocation9], %s1687_s22, %s1687_s22, %s1688_s23  }
  0x25   : > { %s477_s8 = sshll.u32 %s2019_s7, 4  ;;  %s445_s17 = sshll.u32 %s1690_s1, 4  ;;  %s478_s8 = int_to_ptr.hbm [resolvable:$true] %s477_s8  ;;  %s446_s17 = int_to_ptr.vmem [resolvable:$true] %s445_s17 }
  0x26   : > { %1367 = dma.hbm_to_vmem [thread:$0]  (!%p1845_p12), %s444_s16, 128, %s446_s17, [#allocation3]  }
  0x27   : > { %s1691_s6 = smov [#allocation7]   ;;  %s1692_s20 = smov [#allocation10]  }
  0x28   : > { %s479_s29 = sshll.u32 %s1691_s6, 4  ;;  %s513_s30 = sshll.u32 %s1692_s20, 4  ;;  %s480_s29 = int_to_ptr.vmem [resolvable:$true] %s479_s29  ;;  %s514_s30 = int_to_ptr.vmem [resolvable:$true] %s513_s30 }
  0x29   : > { %1373 = dma.hbm_to_vmem [thread:$0]  (!%p1845_p12), %s478_s8, 256, %s480_s29, [#allocation6], %s1687_s22, %s1687_s22, %s1688_s23  }
  0x2a   : > { %1379 = dma.hbm_to_vmem [thread:$0]  (!%p1845_p12), %s512_s27, 256, %s514_s30, [#allocation9], %s1687_s22, %s1687_s22, %s1688_s23  }
  0x2b   : > { %558 = sbr.rel (%p1834_p10) target bundleno = 2047 (0x7ff), region = 88 }
  0x30   : > { %1655 = dma.done.wait (%p1384_p9), [#allocation3], 128  }
  0x31   : > { %1657 = vsyncadd (%p1384_p9), [#allocation3], 4294967168 }
  0x32   : > { %1659 = dma.done.wait (%p1384_p9), [#allocation6], 512  }
  0x33   : > { %1661 = vsyncadd (%p1384_p9), [#allocation6], 4294966784 }
  0x34   : > { %1663 = dma.done.wait (%p1384_p9), [#allocation9], 512  }
  0x35   : > { %1665 = vsyncadd (%p1384_p9), [#allocation9], 4294966784  ;;  %p634_p13 = scmp.lt.s32.totalorder %s1806_s28, 1  ;;  %s2058_s1 = sld [smem:[#allocation23_spill]]  ;;  %v644_v1 = vld [vmem:[#allocation2] sm:$0xff]  ;;  %vm648_vm0 = vcmask 261120  }
  0x36   : > { %v1693_v4 = vmov 32.0   ;;  %v1329_v16 = vld [vmem:[%s2017_s5 + $0x8] sm:$0xff]  ;;  %v1331_v17 = vld [vmem:[#allocation5 + $0x8] sm:$0xff]  ;;  %v1333_v18 = vld [vmem:[#allocation7 + $0x8] sm:$0xff]  ;;  %vm782_vm5 = vcmask 130048   ;;  %s1694_s27 = smov 112  }
  0x37   : > { %s1887_s8 = scalar_select %p634_p13, %s1806_s28, 1  ;;  %1444 = vrcp.f32 %v1693_v4  ;;  %713 = vmatpush.bf16.msra.mxu0 %v1329_v16  ;;  %742 = vmatpush.bf16.msra.mxu1 %v1331_v17  ;;  %v1328_v19 = vld [vmem:[%s2017_s5] sm:$0xff]  ;;  %v1330_v20 = vld [vmem:[#allocation5] sm:$0xff]  ;;  %v1332_v21 = vld [vmem:[#allocation7] sm:$0xff]  ;;  %vm818_vm6 = vcmask 1043456   ;;  %vm802_vm7 = vcmask 64512  }
  0x38   : > { %771 = vmatpush.bf16.msra.mxu2 %v1333_v18  ;;  %v1436_v31 = vld [vmem:[%s2015_s3] ss:$0 sm:$0xff]  ;;  %s2059_s17 = sld [smem:[#allocation24_spill]]  ;;  %vm1052_vm11 = vcmask 523264  }
  0x39   : > { %s1255_s16 = sshll.u32 %s1887_s8, 3  ;;  %v1437_v34 = vld [vmem:[%s2016_s4] ss:$0 sm:$0xff]  ;;  %s2060_s26 = sld [smem:[#allocation28_spill]] }
  0x3b   : > { %s637_s21 = scalar_lea.vmem %s2058_s1, %s1255_s16  ;;  %714 = vmatpush.bf16.msra.mxu0 %v1328_v19  ;;  %743 = vmatpush.bf16.msra.mxu1 %v1330_v20  ;;  %v1334_v20 = vld [vmem:[#allocation8] sm:$0xff] }
  0x3c   : > { %v643_v0 = vld [vmem:[%s637_s21] sm:$0xff]  ;;  %772 = vmatpush.bf16.msra.mxu2 %v1332_v21 }
  0x3d   : > { %v645_v2 = vadd.f32 %v644_v1, %v643_v0  ;;  %v1445_v5 = vpop.eup %1444 }
  0x3e   : > { %v653_v6 = vmul.f32 32.0, %v1445_v5  ;;  %vm657_vm1 = vweird.f32 %v1445_v5  ;;  %s641_s19 = scalar_lea.vmem %s2059_s17, %s1255_s16  ;;  %s1325_s16 = sshll.u32 %s1806_s28, 3 }
  0x3f   : > { %v649_v3 = vsel %vm648_vm0, %v645_v2, 0.0  ;;  %v686_v57 = vld [vmem:[%s641_s19] sm:$0xff]  ;;  %s631_s19 = sand.u32 1, %s1676_s25   ;;  %s2061_s0 = smov %s2060_s26 }
  0x40   : > { %650 = vadd.xlane.f32.xlu0 %v649_v3  ;;  %v654_v7 = vsub.f32 1.0, %v653_v6  ;;  %s1254_s8 = sshll.u32 %s631_s19, 3  ;;  %s1114_s6 = scalar_lea.hbm %s2060_s26, %s1325_s16 }
  0x41   : > { %s633_s20 = scalar_lea.vmem [#allocation11], %s1254_s8  ;;  %s1118_s30 = sshll.u32 %s1114_s6, 4  ;;  %s1119_s30 = int_to_ptr.hbm [resolvable:$true] %s1118_s30 }
  0x42   : > { %v655_v8 = vmul.f32 %v1445_v5, %v654_v7  ;;  %s1116_s28 = sshll.u32 %s633_s20, 4  ;;  %s1104_s17 = scalar_lea.sflag [#allocation4], %s631_s19  ;;  %s1117_s28 = int_to_ptr.vmem [resolvable:$true] %s1116_s28 }
  0x43   : > { %s1624_s1 = sshra.s32 %s1119_s30, 4  ;;  %s1630_s8 = scalar_lea.hbm %s2061_s0, 16  ;;  %s1625_s1 = int_to_ptr.hbm [resolvable:$true] %s1624_s1 }
  0x44   : > { %v656_v9 = vadd.f32 %v1445_v5, %v655_v8  ;;  %s1626_s16 = scalar_lea.hbm %s1625_s1, 8  ;;  %p1631_p3 = scmp.lt.s32.totalorder %s1625_s1, %s2061_s0 }
  0x45   : > { %p1627_p0 = scmp.ne.s32.totalorder %s1625_s1, %s1626_s16  ;;  %p1632_p4 = scmp.lt.s32.totalorder %s1630_s8, %s1626_s16 }
  0x46   : > { %v1896_v10 = vsel %vm657_vm1, %v1445_v5, %v656_v9 }
  0x47   : > { %p1628_p1 = pnand %p1627_p0, %p1823_p5  ;;  %p1633_p7 = por %p1632_p4, %p1631_p3 }
  0x49   : > { %p1629_p2 = pneg %p1628_p1 }
  0x4b   : > { %p1634_p8 = pnand %p1633_p7, %p1629_p2 }
  0xb3   : > { %v651_v11 = vpop.xlane.xlu0 %650 }
  0xb4   : > { %v659_v12 = vmul.f32 %v1896_v10, %v651_v11  ;;  %v1335_v11 = vld [vmem:[#allocation8 + $0x8] sm:$0xff] }
  0xb6   : > { %v660_v13 = vsub.f32 %v645_v2, %v659_v12 }
  0xb8   : > { %v661_v14 = vmul.f32 %v660_v13, %v660_v13 }
  0xba   : > { %v662_v15 = vsel %vm648_vm0, %v661_v14, 0.0 }
  0xbb   : > { %663 = vadd.xlane.f32.xlu0 %v662_v15 }
 0x12e   : > { %v664_v22 = vpop.xlane.xlu0 %663 }
 0x12f   : > { %v665_v23 = vmul.f32 %v664_v22, %v1896_v10 }
 0x131   : > { %v666_v24 = vadd.f32 1e-06, %v665_v23 }
 0x133   : > { %1446 = vrsqrt.f32 %v666_v24  ;;  %vm673_vm3 = vweird.f32 %v666_v24 }
 0x139   : > { %v1447_v25 = vpop.eup %1446 }
 0x13a   : > { %v668_v26 = vmul.f32 %v1447_v25, %v666_v24  ;;  %vm674_vm2 = vweird.f32 %v1447_v25 }
 0x13b   : > { %vm675_vm4 = vmor %vm673_vm3, %vm674_vm2 }
 0x13c   : > { %v669_v27 = vmul.f32 %v1447_v25, %v668_v26 }
 0x13e   : > { %v670_v28 = vmul.f32 0.5, %v669_v27 }
 0x140   : > { %v671_v29 = vsub.f32 1.5, %v670_v28 }
 0x142   : > { %v672_v30 = vmul.f32 %v1447_v25, %v671_v29 }
 0x144   : > { %v676_v32 = vsel %vm675_vm4, %v1447_v25, %v672_v30 }
 0x145   : > { %v677_v33 = vmul.f32 %v676_v32, %v660_v13 }
 0x147   : > { %v681_v35 = vmul.f32 %v1436_v31, %v677_v33 }
 0x149   : > { %v1913_v36 = vadd.f32 %v1437_v34, %v681_v35 }
 0x14b   : > { %v687_v37 = vpack.c.bf16 %v1913_v36, %v1913_v36 }
 0x14d   : > { %1265 = vmatmul.msk.bf16.vlgmr.msra.gmra.mxu0 %vm648_vm0, %v687_v37  ;;  %1274 = vmatmul.msk.bf16.vlgmr.msra.gmra.mxu1 %vm648_vm0, %v687_v37 }
 0x14e   : > { %1283 = vmatmul.msk.bf16.vlgmr.msra.gmra.mxu2 %vm648_vm0, %v687_v37 }
 0x1ca   : > { %v716_v38 = vpop.f32.mrf.mxu0  ;;  %v745_v39 = vpop.f32.mrf.mxu1 }
 0x1cb   : > { %v780_v40 = vpack.c.bf16 %v745_v39, %v745_v39  ;;  %v778_v42 = vmul.f32 0.25, %v716_v38 }
 0x1cd   : > { %842 = vrot.lane.b32.xlu1 %v780_v40, %s1694_s27  ;;  %v787_v41 = vsel %vm782_vm5, %v780_v40, 0  ;;  %v779_v47 = vpack.c.bf16 %v778_v42, %v778_v42  ;;  %v1337_v40 = vld [vmem:[#allocation10 + $0x8] sm:$0xff] }
 0x1ce   : > { %796 = vmatpush.bf16.xpose.msra.mxu3 %v787_v41  ;;  %v1336_v41 = vld [vmem:[#allocation10] sm:$0xff] }
 0x1d1   : > { %v774_v43 = vpop.f32.mrf.mxu2 }
 0x1d2   : > { %v781_v44 = vpack.c.bf16 %v774_v43, %v774_v43  ;;  %v718_v45 = vpop.f32.mrf.mxu0  ;;  %v747_v46 = vpop.f32.mrf.mxu1 }
 0x1d4   : > { %v820_v48 = vsel %vm818_vm6, %v781_v44, 0 }
 0x1d5   : > { %829 = vmatpush.bf16.msrb.mxu0 %v820_v48  ;;  %839 = vrot.lane.b32.xlu1 %v779_v47, %s1694_s27 }
 0x1d6   : > { %1284 = vmatmul.msk.bf16.vlgmr.msra.gmra.mxu3 %vm782_vm5, %v779_v47 }
 0x1d7   : > { %916 = vmatpush.bf16.msrb.mxu3 %v1335_v11 }
 0x1d9   : > { %v776_v49 = vpop.f32.mrf.mxu2  ;;  %938 = vmatpush.bf16.msra.mxu0 %v1334_v20 }
 0x1dd   : > { %876 = vrot.lane.b32.xlu1 %v781_v44, %s1694_s27  ;;  %v1340_v44 = vld [vmem:[%s2025_s13 + $0x10] sm:$0xff]  ;;  %s2063_s27 = sld [smem:[#allocation27_spill]] }
 0x23f   : > { %v843_v50 = vpop.permute.xlu1 %842 }
 0x240   : > { %v848_v51 = vsel %vm782_vm5, %v843_v50, 0 }
 0x241   : > { %857 = vmatpush.bf16.xpose.msrb.mxu1 %v848_v51 }
 0x247   : > { %v840_v52 = vpop.permute.xlu1 %839 }
 0x248   : > { %1286 = vmatmul.msk.bf16.vlgmr.msrb.gmra.mxu1 %vm782_vm5, %v840_v52  ;;  %v1438_v52 = vld [vmem:[%s2021_s9] ss:$0 sm:$0xff] }
 0x249   : > { %1007 = vmatpush.bf16.msra.mxu1 %v1337_v40 }
 0x24d   : > { %1008 = vmatpush.bf16.msra.mxu1 %v1336_v41 }
 0x24f   : > { %v877_v53 = vpop.permute.xlu1 %876 }
 0x250   : > { %v882_v54 = vsel %vm818_vm6, %v877_v53, 0 }
 0x251   : > { %891 = vmatpush.bf16.msrb.mxu2 %v882_v54  ;;  %v1439_v54 = vld [vmem:[%s2022_s10] ss:$0 sm:$0xff] }
 0x259   : > { %v798_v55 = vpop.f32.mrf.mxu3 }
 0x25a   : > { %v799_v61 = vadd.f32 %v798_v55, %v686_v57 }
 0x25c   : > { %v803_v63 = vsel %vm802_vm7, %v799_v61, -inf }
 0x261   : > { %v800_v56 = vpop.f32.mrf.mxu3 }
 0x2c5   : > { %v859_v58 = vpop.f32.mrf.mxu1 }
 0x2c6   : > { %v860_v59 = vadd.f32 %v859_v58, %v686_v57 }
 0x2c8   : > { %v863_v60 = vsel %vm802_vm7, %v860_v59, -inf }
 0x2c9   : > { %864 = vmax.xlane.f32.xlu2 %v863_v60  ;;  %v1338_v60 = vld [vmem:[%s2025_s13] sm:$0xff] }
 0x2cd   : > { %v861_v62 = vpop.f32.mrf.mxu1 }
 0x2d1   : > { %804 = vmax.xlane.f32.xlu2 %v803_v63 }
 0x33c   : > { %v865_v0 = vpop.xlane.xlu2 %864 }
 0x33d   : > { %v866_v1 = vsub.f32 %v860_v59, %v865_v0  ;;  %v1339_v59 = vld [vmem:[%s2025_s13 + $0x8] sm:$0xff] }
 0x33f   : > { %v867_v2 = vmul.f32 1.442695, %v866_v1 }
 0x341   : > { %1448 = vpow2.f32 %v867_v2 }
 0x344   : > { %v805_v3 = vpop.xlane.xlu2 %804 }
 0x345   : > { %v806_v4 = vsub.f32 %v799_v61, %v805_v3  ;;  %v1440_v61 = vld [vmem:[%s2024_s12] ss:$0 sm:$0xff] }
 0x346   : > { %v1441_v3 = vld [vmem:[%s2026_s14] ss:$0 sm:$0xff] }
 0x347   : > { %v1449_v5 = vpop.eup %1448  ;;  %v807_v6 = vmul.f32 1.442695, %v806_v4 }
 0x348   : > { %v869_v7 = vsel %vm802_vm7, %v1449_v5, 0.0 }
 0x349   : > { %1450 = vpow2.f32 %v807_v6  ;;  %870 = vadd.xlane.f32.xlu0 %v869_v7 }
 0x34f   : > { %v1451_v8 = vpop.eup %1450 }
 0x350   : > { %v809_v9 = vsel %vm802_vm7, %v1451_v8, 0.0 }
 0x351   : > { %810 = vadd.xlane.f32.xlu2 %v809_v9 }
 0x3bc   : > { %v871_v12 = vpop.xlane.xlu0 %870 }
 0x3bd   : > { %1452 = vrcp.f32 %v871_v12 }
 0x3c3   : > { %v1453_v13 = vpop.eup %1452 }
 0x3c4   : > { %v873_v14 = vmul.f32 %v1453_v13, %v1449_v5  ;;  %v811_v15 = vpop.xlane.xlu2 %810 }
 0x3c5   : > { %1454 = vrcp.f32 %v811_v15 }
 0x3c6   : > { %v874_v16 = vpack.c.bf16 %v873_v14, %v873_v14 }
 0x3c8   : > { %1287 = vmatmul.msk.bf16.vlgmr.msrb.gmra.mxu2 %vm802_vm7, %v874_v16 }
 0x3cb   : > { %v1455_v17 = vpop.eup %1454 }
 0x3cc   : > { %v813_v18 = vmul.f32 %v1455_v17, %v1451_v8 }
 0x3ce   : > { %v814_v19 = vpack.c.bf16 %v813_v18, %v813_v18 }
 0x3d0   : > { %1285 = vmatmul.msk.bf16.vlgmr.msrb.gmra.mxu0 %vm802_vm7, %v814_v19 }
 0x44b   : > { %v893_v21 = vpop.f32.mrf.mxu2 }
 0x44c   : > { %v897_v22 = vpack.c.bf16 %v893_v21, %v893_v21 }
 0x44d   : > { %v831_v23 = vpop.f32.mrf.mxu0 }
 0x44e   : > { %v835_v24 = vpack.c.bf16 %v831_v23, %v831_v23  ;;  %1292 = vmatmul.msk.bf16.vlgmr.msrb.gmra.mxu3 %vm782_vm5, %v897_v22 }
 0x450   : > { %1297 = vmatmul.msk.bf16.vlgmr.msra.gmra.mxu0 %vm782_vm5, %v835_v24  ;;  %v1442_v24 = vld [vmem:[%s2027_s15] ss:$0 sm:$0xff] }
 0x453   : > { %v895_v25 = vpop.f32.mrf.mxu2 }
 0x455   : > { %v833_v26 = vpop.f32.mrf.mxu0 }
 0x456   : > { %v1443_v26 = vld [vmem:[%s2063_s27] ss:$0 sm:$0xff] }
 0x4cd   : > { %v940_v27 = vpop.f32.mrf.mxu0 }
 0x4d1   : > { %v918_v28 = vpop.f32.mrf.mxu3 }
 0x4d2   : > { %v941_v29 = vadd.f32 %v940_v27, %v918_v28 }
 0x4d4   : > { %v944_v30 = vadd.f32 %v941_v29, %v1913_v36  ;;  %v1341_v36 = vld [vmem:[%s2025_s13 + $0x18] sm:$0xff] }
 0x4d5   : > { %v942_v31 = vpop.f32.mrf.mxu0  ;;  %1060 = vmatpush.bf16.msra.mxu2 %v1341_v36 }
 0x4d6   : > { %v947_v32 = vsel %vm648_vm0, %v944_v30, 0.0 }
 0x4d7   : > { %948 = vadd.xlane.f32.xlu0 %v947_v32 }
 0x4d9   : > { %v920_v33 = vpop.f32.mrf.mxu3  ;;  %1061 = vmatpush.bf16.msra.mxu2 %v1340_v44 }
 0x4dd   : > { %1062 = vmatpush.bf16.msra.mxu2 %v1339_v59 }
 0x4e1   : > { %1063 = vmatpush.bf16.msra.mxu2 %v1338_v60 }
 0x54a   : > { %v949_v34 = vpop.xlane.xlu0 %948 }
 0x54b   : > { %v950_v35 = vmul.f32 %v949_v34, %v1896_v10 }
 0x54d   : > { %v951_v37 = vsub.f32 %v944_v30, %v950_v35 }
 0x54f   : > { %v952_v38 = vmul.f32 %v951_v37, %v951_v37 }
 0x551   : > { %v953_v39 = vsel %vm648_vm0, %v952_v38, 0.0 }
 0x552   : > { %954 = vadd.xlane.f32.xlu1 %v953_v39 }
 0x5c5   : > { %v955_v42 = vpop.xlane.xlu1 %954 }
 0x5c6   : > { %v956_v43 = vmul.f32 %v955_v42, %v1896_v10 }
 0x5c8   : > { %v957_v45 = vadd.f32 1e-06, %v956_v43 }
 0x5ca   : > { %1456 = vrsqrt.f32 %v957_v45  ;;  %vm964_vm9 = vweird.f32 %v957_v45 }
 0x5d0   : > { %v1457_v46 = vpop.eup %1456 }
 0x5d1   : > { %v959_v47 = vmul.f32 %v1457_v46, %v957_v45  ;;  %vm965_vm8 = vweird.f32 %v1457_v46 }
 0x5d2   : > { %vm966_vm10 = vmor %vm964_vm9, %vm965_vm8 }
 0x5d3   : > { %v960_v48 = vmul.f32 %v1457_v46, %v959_v47 }
 0x5d5   : > { %v961_v49 = vmul.f32 0.5, %v960_v48 }
 0x5d7   : > { %v962_v50 = vsub.f32 1.5, %v961_v49 }
 0x5d9   : > { %v963_v51 = vmul.f32 %v1457_v46, %v962_v50 }
 0x5db   : > { %v967_v53 = vsel %vm966_vm10, %v1457_v46, %v963_v51 }
 0x5dc   : > { %v968_v55 = vmul.f32 %v967_v53, %v951_v37 }
 0x5de   : > { %v972_v56 = vmul.f32 %v1438_v52, %v968_v55 }
 0x5e0   : > { %v976_v57 = vadd.f32 %v1439_v54, %v972_v56 }
 0x5e2   : > { %v977_v58 = vpack.c.bf16 %v976_v57, %v976_v57 }
 0x5e4   : > { %1306 = vmatmul.msk.bf16.vlgmr.msra.gmra.mxu1 %vm648_vm0, %v977_v58 }
 0x661   : > { %v1010_v62 = vpop.f32.mrf.mxu1 }
 0x662   : > { %v1011_v63 = vadd.f32 %v1440_v61, %v1010_v62 }
 0x664   : > { %v1014_v0 = vmax.f32 %v1011_v63, 0.0 }
 0x666   : > { %v1015_v1 = vpack.c.bf16 %v1014_v0, %v1014_v0 }
 0x668   : > { %1323 = vmatmul.msk.bf16.vlgmr.msra.gmra.mxu2 %vm1052_vm11, %v1015_v1 }
 0x669   : > { %v1012_v2 = vpop.f32.mrf.mxu1 }
 0x6eb   : > { %v1065_v4 = vpop.f32.mrf.mxu2 }
 0x6ec   : > { %v1066_v5 = vadd.f32 %v1441_v3, %v1065_v4 }
 0x6ee   : > { %v1069_v6 = vadd.f32 %v1066_v5, %v976_v57 }
 0x6f0   : > { %v1072_v7 = vsel %vm648_vm0, %v1069_v6, 0.0 }
 0x6f1   : > { %1073 = vadd.xlane.f32.xlu2 %v1072_v7 }
 0x6f3   : > { %v1067_v8 = vpop.f32.mrf.mxu2 }
 0x764   : > { %v1074_v9 = vpop.xlane.xlu2 %1073 }
 0x765   : > { %v1075_v11 = vmul.f32 %v1074_v9, %v1896_v10 }
 0x767   : > { %v1076_v12 = vsub.f32 %v1069_v6, %v1075_v11 }
 0x769   : > { %v1077_v13 = vmul.f32 %v1076_v12, %v1076_v12 }
 0x76b   : > { %v1078_v14 = vsel %vm648_vm0, %v1077_v13, 0.0 }
 0x76c   : > { %1079 = vadd.xlane.f32.xlu0 %v1078_v14 }
 0x7df   : > { %v1080_v15 = vpop.xlane.xlu0 %1079 }
 0x7e0   : > { %v1081_v16 = vmul.f32 %v1080_v15, %v1896_v10 }
 0x7e2   : > { %v1082_v17 = vadd.f32 1e-06, %v1081_v16 }
 0x7e4   : > { %1458 = vrsqrt.f32 %v1082_v17  ;;  %vm1089_vm13 = vweird.f32 %v1082_v17 }
 0x7ea   : > { %v1459_v18 = vpop.eup %1458 }
 0x7eb   : > { %v1084_v19 = vmul.f32 %v1459_v18, %v1082_v17  ;;  %vm1090_vm12 = vweird.f32 %v1459_v18 }
 0x7ec   : > { %vm1091_vm14 = vmor %vm1089_vm13, %vm1090_vm12 }
 0x7ed   : > { %v1085_v20 = vmul.f32 %v1459_v18, %v1084_v19 }
 0x7ef   : > { %v1086_v21 = vmul.f32 0.5, %v1085_v20 }
 0x7f1   : > { %v1087_v22 = vsub.f32 1.5, %v1086_v21 }
 0x7f3   : > { %v1088_v23 = vmul.f32 %v1459_v18, %v1087_v22 }
 0x7f5   : > { %v1092_v10 = vsel %vm1091_vm14, %v1459_v18, %v1088_v23 }
 0x7f6   : > { %v1093_v25 = vmul.f32 %v1092_v10, %v1076_v12 }
 0x7f8   : > { %v1097_v27 = vmul.f32 %v1442_v24, %v1093_v25 }
 0x7fa   : > { %v1101_v28 = vadd.f32 %v1443_v26, %v1097_v27 }
 0x7fc   : > { %1102 = vst.msk [vmem:[%s633_s20] sm:$0xff] %vm648_vm0, %v1101_v28 }
 0x7fd   : > { %1637 = shalt.err (!%p1634_p8)
}
 0x7fe   : > { %1362 = dma.vmem_to_hbm [thread:$0]  (%p1823_p5), %s1117_s28, 128, %s1119_s30, %s1104_s17  }
 0x7ff PF: > { %s2064_s19 = sld [smem:[#allocation18_spill]] }
 0x800   : > { %s2065_s6 = sld [smem:[#allocation16_spill]] }
 0x805   : > { %p1394_p9 = scmp.ge.s32.totalorder %s2064_s19, 2 }
 0x806   : > { %s1130_s24 = sand.u32 1, %s2065_s6  }
 0x807   : > { %p1381_p10 = pnand %p1394_p9, %p1827_p6  ;;  %s1131_s27 = scalar_lea.sflag [#allocation4], %s1130_s24 }
 0x809   : > { %p1382_p11 = pneg %p1381_p10 }
 0x80b   : > { %1667 = dma.done.wait (%p1382_p11), %s1131_s27, 128  }
 0x80c   : > { %1669 = vsyncadd (%p1382_p11), %s1131_s27, 4294967168  ;;  %s2067_s27 = sld [smem:[#allocation19_spill]]  ;;  %s2070_s24 = smov %s1676_s25 }
 0x80d   : > { %s2068_s20 = sld [smem:[#allocation17_spill]] }
 0x80e   : > { %s2069_s26 = sld [smem:[#allocation20_spill]] }
 0x812   : > { %p30_p12 = scmp.ge.s32.totalorder %s2067_s27, 4  }
 0x813   : > { %s2071_s25 = smov %s2068_s20 }
 0x814   :  { %32 = sbr.rel (!%p30_p12) target bundleno = 13 (0xd), region = 147 }
 0x819   :  { %1137 = vsyncpa [#allocation3], 1 }
 0x81a   :  { %1139 = vsyncpa [#allocation3 + $0x1], 1 }
 0x81b   :  { %1140 = vsyncpa [#allocation6], 1 }
 0x81c   :  { %1141 = vsyncpa [#allocation9], 1 }
 0x81d   :  { %1142 = vsyncpa [#allocation4], 1 }
 0x81e   :  { %1144 = vsyncpa [#allocation4 + $0x1], 1 }

</bundles_post_ra>
